<compile_context>
chip_gen: v7x
topology: tpu7x:2x2x1
jax: 0.10.0
libtpu: 0.0.40
codegen_flags: <defaults>
</compile_context>

<pallas_src>
import jax
import jax.numpy as jnp
from jax.experimental import pallas as pl
from jax.experimental.pallas import tpu as pltpu


def _pick_tile_n(n, c, itemsize):
    """Largest lane-aligned spatial tile that divides N and fits a VMEM budget."""
    if n % 128 != 0:
        # Full-extent block is always a legal BlockSpec; keeps the kernels
        # mask-free for ragged spatial sizes.
        return n
    # ~2 MiB per feature block => double-buffered in + out feature blocks stay
    # well under the 32 MiB default scoped VMEM and v7x's 64 MiB physical VMEM.
    budget = 2 * 1024 * 1024
    max_tn = max(128, (budget // max(1, c * itemsize)) // 128 * 128)
    m = n // 128
    best = 128
    for d in range(1, m + 1):
        if m % d == 0 and 128 * d <= max_tn:
            best = 128 * d
    return best


def _stats_kernel(x_ref, w1_ref, b1_ref, sgg_ref, sg_ref):
    """Accumulate sum(G G^T) and sum(g) for G = conv1(x) over spatial tiles."""

    @pl.when(pl.program_id(1) == 0)
    def _():
        sgg_ref[...] = jnp.zeros_like(sgg_ref)
        sg_ref[...] = jnp.zeros_like(sg_ref)

    gx = (jnp.dot(w1_ref[...], x_ref[...], preferred_element_type=jnp.float32)
          + b1_ref[...])
    # G @ G^T without materializing a transpose: contract the lane axes.
    sgg_ref[...] += jax.lax.dot_general(
        gx, gx, dimension_numbers=(((1,), (1,)), ((), ())),
        preferred_element_type=jnp.float32)
    sg_ref[...] += jnp.sum(gx, axis=-1, keepdims=True)


def _apply_kernel(x_ref, m_ref, b_ref, out_ref):
    """out = x + M' @ x + b' (conv1, centering, projector, conv2 pre-folded)."""
    x = x_ref[...]
    att = (jnp.dot(m_ref[...], x, preferred_element_type=jnp.float32)
           + b_ref[...])
    out_ref[...] = (x.astype(jnp.float32) + att).astype(out_ref.dtype)


def sapca_block_v4(x, params):
    B, C, H, W = x.shape
    k = -(-C // 4)                       # matches torch's eigvec[:, -C//4:]
    N = H * W
    TN = _pick_tile_n(N, C, jnp.dtype(x.dtype).itemsize)
    n_tiles = pl.cdiv(N, TN)

    w1 = params["w1"].astype(jnp.float32)   # (C, C) conv1 weight
    b1 = params["b1"].astype(jnp.float32)   # (C, 1) conv1 bias
    w2 = params["w2"].astype(jnp.float32)   # (C, C) conv2 weight (no bias)

    xf = x.reshape(B, C, N)                 # no cast / pad: native-dtype blocks

    feat_spec = pl.BlockSpec((None, C, TN), lambda b, t: (b, 0, t))
    cc_spec = pl.BlockSpec((None, C, C), lambda b, t: (b, 0, 0))
    c1_spec = pl.BlockSpec((None, C, 1), lambda b, t: (b, 0, 0))
    w1_spec = pl.BlockSpec((C, C), lambda b, t: (0, 0))
    b1_spec = pl.BlockSpec((C, 1), lambda b, t: (0, 0))

    vmem_cap = 64 * 1024 * 1024             # <= physical VMEM on v5e/v6e/v7x

    # --- Kernel A: per-batch sum(G G^T) and sum(g) over the spatial axis. ----
    sum_gg, sum_g = pl.pallas_call(
        _stats_kernel,
        out_shape=(jax.ShapeDtypeStruct((B, C, C), jnp.float32),
                   jax.ShapeDtypeStruct((B, C, 1), jnp.float32)),
        grid=(B, n_tiles),
        in_specs=[feat_spec, w1_spec, b1_spec],
        out_specs=(cc_spec, c1_spec),
        compiler_params=pltpu.CompilerParams(
            dimension_semantics=("parallel", "arbitrary"),
            vmem_limit_bytes=vmem_cap),
    )(xf, w1, b1)

    # --- Glue (plain JAX): tiny per-batch (C, C) math on the critical path. --
    # TODO(synk): torch.symeig (batched symmetric eigendecomposition) has no
    # Pallas/Mosaic lowering; the (C, C)-per-batch eigh stays in plain JAX.
    mean = sum_g * (1.0 / N)                                          # (B, C, 1)
    cmat = sum_gg - jnp.einsum("bco,bdo->bcd", sum_g, sum_g,
                               precision="highest") * (1.0 / N)
    # NOTE: torch also divides cmat by B; eigenvectors are scale-invariant, so
    # the normalization is dropped here (don't "fix" it on only one side).
    _, eigvec = jnp.linalg.eigh(cmat)                                 # ascending
    vk = eigvec[..., -k:]                                             # (B, C, k)
    # Skinny folding: M' = W2 Vk Vk^T W1, b' = W2 Vk Vk^T (b1 - mean).
    t = jnp.einsum("oc,bck->bok", w2, vk, precision="highest")        # (B, C, k)
    s = jnp.einsum("bck,cd->bkd", vk, w1, precision="highest")        # (B, k, C)
    m_mat = jnp.einsum("bok,bkd->bod", t, s, precision="highest")     # (B, C, C)
    r = jnp.einsum("bck,bcx->bkx", vk, b1[None] - mean,
                   precision="highest")                               # (B, k, 1)
    b_vec = jnp.einsum("bok,bkx->box", t, r, precision="highest")     # (B, C, 1)

    # --- Kernel B: out = x + M' @ x + b'. ------------------------------------
    out = pl.pallas_call(
        _apply_kernel,
        out_shape=jax.ShapeDtypeStruct((B, C, N), x.dtype),
        grid=(B, n_tiles),
        in_specs=[feat_spec, cc_spec, c1_spec],
        out_specs=feat_spec,
        compiler_params=pltpu.CompilerParams(
            dimension_semantics=("parallel", "parallel"),
            vmem_limit_bytes=vmem_cap),
    )(xf, m_mat, b_vec)

    return out.reshape(B, C, H, W)


def _reference(x, params):
    """Pure-JAX mirror of the PyTorch forward (torch.symeig returns ascending)."""
    B, C, H, W = x.shape
    k = -(-C // 4)
    w1, b1, w2 = params["w1"], params["b1"], params["w2"]
    gx = (jnp.einsum("oc,bchw->bohw", w1, x, precision="highest")
          + b1.reshape(1, C, 1, 1))
    gxf = gx.reshape(B, C, -1)
    gxf = gxf - jnp.mean(gxf, axis=-1, keepdims=True)
    cmat = jnp.einsum("bin,bjn->bij", gxf, gxf, precision="highest") / B
    _, eigvec = jnp.linalg.eigh(cmat)
    w = jnp.swapaxes(eigvec[..., -k:], -1, -2)      # (B, k, C)
    z = jnp.einsum("bkc,bcn->bkn", w, gxf, precision="highest")
    y = jnp.einsum("bkc,bkn->bcn", w, z, precision="highest")
    att = jnp.einsum("oc,bcn->bon", w2, y, precision="highest")
    return x + att.reshape(B, C, H, W)


if __name__ == "__main__":
    B, C, H, W = 2, 8, 16, 16        # C multiple of 4 -> top C//4 eigenvectors
    key = jax.random.PRNGKey(0)
    kx, k1, kb, k2 = jax.random.split(key, 4)
    x = jax.random.normal(kx, (B, C, H, W), jnp.float32)
    params = {
        "w1": jax.random.normal(k1, (C, C), jnp.float32) * 0.3,
        "b1": jax.random.normal(kb, (C, 1), jnp.float32) * 0.1,
        "w2": jax.random.normal(k2, (C, C), jnp.float32) * 0.3,
    }

    out = jax.block_until_ready(sapca_block_v4(x, params))
    ref = jax.block_until_ready(_reference(x, params))

    assert out.shape == x.shape and out.dtype == x.dtype
    err = float(jnp.max(jnp.abs(out - ref)))
    assert jnp.allclose(out, ref, rtol=1e-2, atol=1e-2), err
    print("KERNEL_OK")
</pallas_src>

<mosaic_0001>
module attributes {stable_mosaic.version = 11 : i64} {
  func.func @_stats_kernel(%arg0: i32, %arg1: i32, %arg2: memref<1x8x256xf32, #tpu.memory_space<vmem>>, %arg3: memref<8x8xf32, #tpu.memory_space<vmem>>, %arg4: memref<8x1xf32, #tpu.memory_space<vmem>>, %arg5: memref<1x8x8xf32, #tpu.memory_space<vmem>>, %arg6: memref<1x8x1xf32, #tpu.memory_space<vmem>>) attributes {dimension_semantics = [#tpu.dimension_semantics<parallel>, #tpu.dimension_semantics<arbitrary>], iteration_bounds = array<i64: 2, 1>, scalar_prefetch = 0 : i64, scratch_operands = 0 : i64, tpu.core_type = #tpu.core_type<tc>, window_params = [{transform_indices = @transform_0, window_bounds = array<i64: 1, 8, 256>}, {pipeline_mode = #tpu.pipeline_mode<synchronous>, transform_indices = @transform_1, window_bounds = array<i64: 8, 8>}, {pipeline_mode = #tpu.pipeline_mode<synchronous>, transform_indices = @transform_2, window_bounds = array<i64: 8, 1>}, {transform_indices = @transform_3, window_bounds = array<i64: 1, 8, 8>}, {transform_indices = @transform_4, window_bounds = array<i64: 1, 8, 1>}]} {
    %c0_i32 = arith.constant 0 : i32
    %0 = arith.cmpi eq, %arg1, %c0_i32 : i32
    %1 = arith.extui %0 : i1 to i32
    %c0_i32_0 = arith.constant 0 : i32
    %2 = arith.cmpi ne, %1, %c0_i32_0 : i32
    scf.if %2 {
      %cst_21 = arith.constant 0.000000e+00 : f32
      %25 = vector.broadcast %cst_21 : f32 to vector<8x8xf32>
      %c0_22 = arith.constant 0 : index
      %c0_23 = arith.constant 0 : index
      %c0_24 = arith.constant 0 : index
      %26 = vector.load %arg5[%c0_22, %c0_23, %c0_24] : memref<1x8x8xf32, #tpu.memory_space<vmem>>, vector<1x8x8xf32>
      %27 = vector.shape_cast %26 : vector<1x8x8xf32> to vector<8x8xf32>
      %28 = vector.shape_cast %25 : vector<8x8xf32> to vector<1x8x8xf32>
      tpu.vector_store %arg5[%c0_22, %c0_23, %c0_24], %28 {strides = array<i32>} : memref<1x8x8xf32, #tpu.memory_space<vmem>>, vector<1x8x8xf32>,
      %cst_25 = arith.constant 0.000000e+00 : f32
      %29 = vector.broadcast %cst_25 : f32 to vector<8x1xf32>
      %c0_26 = arith.constant 0 : index
      %c0_27 = arith.constant 0 : index
      %c0_28 = arith.constant 0 : index
      %30 = vector.load %arg6[%c0_26, %c0_27, %c0_28] : memref<1x8x1xf32, #tpu.memory_space<vmem>>, vector<1x8x1xf32>
      %31 = vector.shape_cast %30 : vector<1x8x1xf32> to vector<8x1xf32>
      %32 = vector.shape_cast %29 : vector<8x1xf32> to vector<1x8x1xf32>
      tpu.vector_store %arg6[%c0_26, %c0_27, %c0_28], %32 {strides = array<i32>} : memref<1x8x1xf32, #tpu.memory_space<vmem>>, vector<1x8x1xf32>,
    } else {
    }
    %c0 = arith.constant 0 : index
    %c0_1 = arith.constant 0 : index
    %3 = vector.load %arg3[%c0, %c0_1] : memref<8x8xf32, #tpu.memory_space<vmem>>, vector<8x8xf32>
    %c0_2 = arith.constant 0 : index
    %c0_3 = arith.constant 0 : index
    %c0_4 = arith.constant 0 : index
    %4 = vector.load %arg2[%c0_2, %c0_3, %c0_4] : memref<1x8x256xf32, #tpu.memory_space<vmem>>, vector<1x8x256xf32>
    %5 = vector.shape_cast %4 : vector<1x8x256xf32> to vector<8x256xf32>
    %cst = arith.constant dense<0.000000e+00> : vector<8x256xf32>
    %6 = tpu.matmul %3, %5, %cst {dimension_numbers = #tpu.dot_dimension_numbers<[1], [0], [0], [1], [0, 0, 1, 1], [], []>} : vector<8x8xf32>, vector<8x256xf32>, vector<8x256xf32> -> vector<8x256xf32>
    %c0_5 = arith.constant 0 : index
    %c0_6 = arith.constant 0 : index
    %7 = vector.load %arg4[%c0_5, %c0_6] : memref<8x1xf32, #tpu.memory_space<vmem>>, vector<8x1xf32>
    %8 = vector.broadcast %7 : vector<8x1xf32> to vector<8x256xf32>
    %9 = arith.addf %6, %8 : vector<8x256xf32>
    %c0_7 = arith.constant 0 : index
    %c0_8 = arith.constant 0 : index
    %c0_9 = arith.constant 0 : index
    %10 = vector.load %arg5[%c0_7, %c0_8, %c0_9] : memref<1x8x8xf32, #tpu.memory_space<vmem>>, vector<1x8x8xf32>
    %11 = vector.shape_cast %10 : vector<1x8x8xf32> to vector<8x8xf32>
    %cst_10 = arith.constant dense<0.000000e+00> : vector<8x8xf32>
    %12 = tpu.matmul %9, %9, %cst_10 {dimension_numbers = #tpu.dot_dimension_numbers<[1], [1], [0], [0], [0, 0, 1, 0], [], []>} : vector<8x256xf32>, vector<8x256xf32>, vector<8x8xf32> -> vector<8x8xf32>
    %13 = arith.addf %11, %12 : vector<8x8xf32>
    %c0_11 = arith.constant 0 : index
    %c0_12 = arith.constant 0 : index
    %c0_13 = arith.constant 0 : index
    %14 = vector.load %arg5[%c0_11, %c0_12, %c0_13] : memref<1x8x8xf32, #tpu.memory_space<vmem>>, vector<1x8x8xf32>
    %15 = vector.shape_cast %14 : vector<1x8x8xf32> to vector<8x8xf32>
    %16 = vector.shape_cast %13 : vector<8x8xf32> to vector<1x8x8xf32>
    tpu.vector_store %arg5[%c0_11, %c0_12, %c0_13], %16 {strides = array<i32>} : memref<1x8x8xf32, #tpu.memory_space<vmem>>, vector<1x8x8xf32>,
    %c0_14 = arith.constant 0 : index
    %c0_15 = arith.constant 0 : index
    %c0_16 = arith.constant 0 : index
    %17 = vector.load %arg6[%c0_14, %c0_15, %c0_16] : memref<1x8x1xf32, #tpu.memory_space<vmem>>, vector<1x8x1xf32>
    %18 = vector.shape_cast %17 : vector<1x8x1xf32> to vector<8x1xf32>
    %cst_17 = arith.constant dense<0.000000e+00> : vector<8xf32>
    %19 = vector.multi_reduction <add>, %9, %cst_17 [1] : vector<8x256xf32> to vector<8xf32>
    %20 = vector.shape_cast %19 : vector<8xf32> to vector<8x1xf32>
    %21 = arith.addf %18, %20 : vector<8x1xf32>
    %c0_18 = arith.constant 0 : index
    %c0_19 = arith.constant 0 : index
    %c0_20 = arith.constant 0 : index
    %22 = vector.load %arg6[%c0_18, %c0_19, %c0_20] : memref<1x8x1xf32, #tpu.memory_space<vmem>>, vector<1x8x1xf32>
    %23 = vector.shape_cast %22 : vector<1x8x1xf32> to vector<8x1xf32>
    %24 = vector.shape_cast %21 : vector<8x1xf32> to vector<1x8x1xf32>
    tpu.vector_store %arg6[%c0_18, %c0_19, %c0_20], %24 {strides = array<i32>} : memref<1x8x1xf32, #tpu.memory_space<vmem>>, vector<1x8x1xf32>,
    return
  }
  func.func @transform_0(%arg0: i32, %arg1: i32) -> (i32, i32, i32) {
    %c0_i32 = arith.constant 0 : i32
    %c0_i32_0 = arith.constant 0 : i32
    return %arg0, %c0_i32, %arg1 : i32, i32, i32
  }
  func.func @transform_1(%arg0: i32, %arg1: i32) -> (i32, i32) {
    %c0_i32 = arith.constant 0 : i32
    %c0_i32_0 = arith.constant 0 : i32
    %c0_i32_1 = arith.constant 0 : i32
    return %c0_i32, %c0_i32_0 : i32, i32
  }
  func.func @transform_2(%arg0: i32, %arg1: i32) -> (i32, i32) {
    %c0_i32 = arith.constant 0 : i32
    %c0_i32_0 = arith.constant 0 : i32
    %c0_i32_1 = arith.constant 0 : i32
    return %c0_i32, %c0_i32_0 : i32, i32
  }
  func.func @transform_3(%arg0: i32, %arg1: i32) -> (i32, i32, i32) {
    %c0_i32 = arith.constant 0 : i32
    %c0_i32_0 = arith.constant 0 : i32
    %c0_i32_1 = arith.constant 0 : i32
    return %arg0, %c0_i32, %c0_i32_0 : i32, i32, i32
  }
  func.func @transform_4(%arg0: i32, %arg1: i32) -> (i32, i32, i32) {
    %c0_i32 = arith.constant 0 : i32
    %c0_i32_0 = arith.constant 0 : i32
    %c0_i32_1 = arith.constant 0 : i32
    return %arg0, %c0_i32, %c0_i32_0 : i32, i32, i32
  }
}

</mosaic_0001>

<bundles_post_ra>
// kernel: tpu_custom_call.1
= control target key start
LH: loop header
LB: loop body
LE: loop exit
PB: predicated region body
PF: predicated region fallthrough
CT: control target
= control target key end

     0   :  { %10 = vsyncpa [#allocation3], 0  ;;  %s1243_s0 = inlined_call_operand.hbm [shape: f32[2,8,256], index: 0, kind: input, shape index: {}]   ;;  %s1244_s1 = inlined_call_operand.hbm [shape: f32[8,8], index: 1, kind: input, shape index: {}]   ;;  %s1245_s2 = inlined_call_operand.hbm [shape: f32[8,1], index: 2, kind: input, shape index: {}]   ;;  %s1246_s3 = inlined_call_operand.hbm [shape: f32[2,8,8], index: 3, kind: output, shape index: {0}]   ;;  %s1247_s4 = inlined_call_operand.hbm [shape: f32[2,8,1], index: 4, kind: output, shape index: {1}]  }
   0x1   :  { %12 = vsyncpa [#allocation3 + $0x1], 0 }
   0x2   :  { %13 = vsyncpa [#allocation6], 0 }
   0x3   :  { %14 = vsyncpa [#allocation4], 0 }
   0x4   :  { %16 = vsyncpa [#allocation4 + $0x1], 0 }
   0x5   :  { %17 = vsyncpa [#allocation10], 0 }
   0x6   :  { %19 = vsyncpa [#allocation10 + $0x1], 0  ;;  %s955_s15 = smov 0   ;;  %s957_s16 = smov 0  }
   0x7   :  { %s959_s17 = smov 0   ;;  %s961_s18 = smov 0  }
   0x8   :  { %s963_s19 = smov 0   ;;  %s965_s20 = smov 0  }
   0x9 LB: > { %s603_s21 = sadd.s32 4294967295, %s921_s20   ;;  %s604_s22 = sadd.s32 4294967294, %s921_s20   ;;  %s921_s20 = sphi %s965_s20, %s25_s20   ;;  %s917_s19 = sphi %s963_s19, %s1270_s19   ;;  %s913_s18 = sphi %s961_s18, %s1269_s18   ;;  %s909_s17 = sphi %s959_s17, %s1268_s17   ;;  %s905_s16 = sphi %s957_s16, %s1267_s16   ;;  %s901_s15 = sphi %s955_s15, %s1266_s15  }
   0xa   : > { %p59_p0 = scmp.ne.s32.totalorder %s905_s16, %s901_s15  ;;  %p989_p1 = scmp.eq.s32.totalorder %s603_s21, 0 }
   0xb   : > { %p993_p2 = scmp.eq.s32.totalorder %s603_s21, 1  ;;  %p131_p3 = scmp.eq.s32.totalorder %s604_s22, 1 }
   0xc   : > { %s1252_s23 = scalar_select %p989_p1, 1, 0 }
   0xd   : > { %s1253_s24 = scalar_select %p993_p2, 1, 0 }
   0xe   : > { %p999_p4 = por %p989_p1, %p59_p0  ;;  %p605_p5 = scmp.ge.s32.totalorder %s921_s20, 1 }
   0xf   : > { %p1004_p6 = por %p131_p3, %p59_p0  ;;  %p164_p7 = scmp.lt.s32.totalorder %s921_s20, 3 }
  0x10   : > { %s1254_s25 = scalar_select %p999_p4, 1, 0 }
  0x11   : > { %s1255_s26 = scalar_select %p1004_p6, 1, 0 }
  0x12   : > { %p1009_p8 = pnand %p605_p5, %p164_p7  ;;  %s923_s28 = smov [#allocation5]  }
  0x13   : > { %s177_s29 = sshll.u32 %s923_s28, 4  ;;  %s924_s30 = smov [#allocation7]   ;;  %s178_s29 = int_to_ptr.vmem [resolvable:$true] %s177_s29 }
  0x14   : > { %s1256_s27 = scalar_select %p1009_p8, 1, 0 }
  0x15   : > { %p640_p10 = pneg %p1009_p8  ;;  %s188_s5 = sshll.u32 %s924_s30, 4  ;;  %s1022_s5 = int_to_ptr.vmem [resolvable:$true] %s188_s5 }
  0x16   : > { %s717_s9 = scalar_lea.hbm %s1244_s1, 128 }
  0x17   : > { %p1018_p11 = pnand %p640_p10, %p989_p1  ;;  %p718_p12 = scmp.ne.s32.totalorder %s1244_s1, %s717_s9 }
  0x18   : > { %p724_p5 = scmp.lt.u32.totalorder %s717_s9, %s1244_s1 }
  0x19   : > { %p719_p13 = pneg %p1018_p11 }
  0x1b   : > { %p720_p0 = pnand %p719_p13, %p718_p12 }
  0x1d   : > { %p721_p3 = pneg %p720_p0 }
  0x1f   : > { %p726_p7 = pnand %p724_p5, %p721_p3 }
  0x21   : > { %729 = shalt.err (!%p726_p7)
}
  0x22   : > { %s730_s14 = scalar_lea.vmem %s178_s29, 128  ;;  %p738_p1 = scmp.lt.s32.totalorder %s178_s29, %s178_s29 }
  0x23   : > { %p731_p10 = scmp.ne.s32.totalorder %s178_s29, %s730_s14  ;;  %p739_p4 = scmp.lt.s32.totalorder %s730_s14, %s730_s14 }
  0x25   : > { %p733_p9 = pnand %p731_p10, %p719_p13  ;;  %p740_p8 = por %p739_p4, %p738_p1 }
  0x27   : > { %p734_p6 = pneg %p733_p9 }
  0x29   : > { %p741_p2 = pnand %p740_p8, %p734_p6 }
  0x2b   : > { %744 = shalt.err (!%p741_p2)
}
  0x2c   : > { %643 = dma.hbm_to_vmem [thread:$0]  (!%p1018_p11), %s1244_s1, 128, %s178_s29, [#allocation6]  }
  0x2d   : > { %s745_s7 = scalar_lea.hbm %s1245_s2, 128 }
  0x2e   : > { %p746_p9 = scmp.ne.s32.totalorder %s1245_s2, %s745_s7  ;;  %p752_p2 = scmp.lt.u32.totalorder %s745_s7, %s1245_s2 }
  0x30   : > { %p748_p1 = pnand %p746_p9, %p719_p13 }
  0x32   : > { %p749_p4 = pneg %p748_p1 }
  0x34   : > { %p754_p6 = pnand %p752_p2, %p749_p4 }
  0x36   : > { %757 = shalt.err (!%p754_p6)
}
  0x37   : > { %s758_s29 = scalar_lea.vmem %s1022_s5, 128  ;;  %p766_p3 = scmp.lt.s32.totalorder %s1022_s5, %s1022_s5 }
  0x38   : > { %p759_p8 = scmp.ne.s32.totalorder %s1022_s5, %s758_s29  ;;  %p767_p5 = scmp.lt.s32.totalorder %s758_s29, %s758_s29 }
  0x3a   : > { %p761_p12 = pnand %p759_p8, %p719_p13  ;;  %p768_p7 = por %p767_p5, %p766_p3 }
  0x3c   : > { %p762_p0 = pneg %p761_p12 }
  0x3e   : > { %p769_p10 = pnand %p768_p7, %p762_p0 }
  0x40   : > { %772 = shalt.err (!%p769_p10)
}
  0x41   : > { %646 = dma.hbm_to_vmem [thread:$0]  (!%p1018_p11), %s1245_s2, 128, %s1022_s5, [#allocation6]  }
  0x42   : > { %s37_s14 = sadd.s32 1, %s917_s19  ;;  %s46_s21 = sadd.s32 1, %s909_s17 }
  0x43   : > { %p39_p13 = scmp.ge.s32.totalorder %s37_s14, 2  ;;  %p53_p9 = scmp.ne.s32.totalorder %s909_s17, %s905_s16 }
  0x44   : > { %p54_p1 = scmp.eq.s32.totalorder %s921_s20, 0  ;;  %p660_p4 = scmp.lt.s32.totalorder %s921_s20, 2 }
  0x45   : > { %s1272_s14 = smov (%p39_p13, %s37_s14), 0  ;;  %p1258_p6 = scmp.ne.s32.totalorder %s1253_s24, 0 }
  0x46   : > { %p55_p2 = por %p54_p1, %p53_p9  ;;  %s41_s22 = ssub.s32 %s917_s19, %s1272_s14 }
  0x47   : > { %p1081_p8 = por %p1258_p6, %p53_p9  ;;  %s199_s28 = sand.u32 1, %s909_s17  }
  0x48   : > { %p44_p12 = scmp.eq.s32.totalorder %s41_s22, 0  ;;  %s609_s5 = sshll.u32 %s199_s28, 4 }
  0x49   : > { %s625_s30 = sshll.u32 %s917_s19, 8  ;;  %s203_s24 = scalar_lea.vmem [#allocation2], %s609_s5 }
  0x4a   : > { %s1090_s7 = scalar_select %p44_p12, %s909_s17, %s46_s21  }
  0x4b   : > { %s1095_s10 = scalar_lea.hbm %s1243_s0, %s625_s30  ;;  %s213_s11 = sshll.u32 %s203_s24, 4  ;;  %s1103_s11 = int_to_ptr.vmem [resolvable:$true] %s213_s11 }
  0x4c   : > { %p1099_p11 = pnand %p660_p4, %p55_p2  ;;  %s200_s12 = scalar_lea.sflag [#allocation3], %s199_s28 }
  0x4d   : > { %s773_s13 = scalar_lea.hbm %s1095_s10, 256  ;;  %s778_s5 = scalar_lea.hbm %s1243_s0, 512 }
  0x4e   : > { %p774_p0 = scmp.ne.s32.totalorder %s1095_s10, %s773_s13  ;;  %p775_p3 = pneg %p1099_p11 }
  0x4f   : > { %p779_p10 = scmp.lt.u32.totalorder %s1095_s10, %s1243_s0  ;;  %p780_p13 = scmp.lt.u32.totalorder %s778_s5, %s773_s13 }
  0x50   : > { %p776_p5 = pnand %p775_p3, %p774_p0  ;;  %p782_p1 = scmp.lt.u32.totalorder %s773_s13, %s1095_s10 }
  0x51   : > { %p781_p9 = por %p780_p13, %p779_p10 }
  0x52   : > { %p777_p7 = pneg %p776_p5 }
  0x53   : > { %p783_p4 = por %p782_p1, %p781_p9 }
  0x55   : > { %p784_p2 = pnand %p783_p4, %p777_p7 }
  0x57   : > { %787 = shalt.err (!%p784_p2)
}
  0x58   : > { %s788_s28 = scalar_lea.vmem %s1103_s11, 256  ;;  %s925_s9 = smov [#allocation2]  }
  0x59   : > { %p789_p6 = scmp.ne.s32.totalorder %s1103_s11, %s788_s28  ;;  %s793_s24 = sshll.u32 %s925_s9, 4  ;;  %s794_s24 = int_to_ptr.vmem [resolvable:$false] %s793_s24 }
  0x5a   : > { %s795_s21 = scalar_lea.vmem %s794_s24, 512  ;;  %p796_p5 = scmp.lt.s32.totalorder %s1103_s11, %s794_s24 }
  0x5b   : > { %p791_p12 = pnand %p789_p6, %p775_p3  ;;  %p797_p10 = scmp.lt.s32.totalorder %s795_s21, %s788_s28 }
  0x5d   : > { %p792_p0 = pneg %p791_p12  ;;  %p798_p13 = por %p797_p10, %p796_p5 }
  0x5f   : > { %p799_p9 = pnand %p798_p13, %p792_p0 }
  0x61   : > { %802 = shalt.err (!%p799_p9)
}
  0x62   : > { %650 = dma.hbm_to_vmem [thread:$0]  (!%p1099_p11), %s1095_s10, 256, %s1103_s11, %s200_s12  }
  0x63   : > { %p1261_p7 = scmp.ne.s32.totalorder %s1256_s27, 0 }
  0x64   : > { %s1133_s13 = sand.u32 (!%p1261_p7), 1, %s905_s16   ;;  %p1262_p3 = scmp.ne.s32.totalorder (!%p1261_p7), %s1254_s25, 0 }
  0x65   : > { %222 = sbr.rel (%p1261_p7) target bundleno = 563 (0x233), region = 32  ;;  %s613_s22 = sshll.u32 (!%p1261_p7), %s1133_s13, 4 }
  0x66   : > { %s225_s5 = scalar_lea.sflag (!%p1261_p7), [#allocation3], %s1133_s13  ;;  %s228_s30 = scalar_lea.vmem (!%p1261_p7), [#allocation2], %s613_s22 }
  0x6c   : > { %884 = dma.done.wait (%p1262_p3), %s225_s5, 256  }
  0x6d   : > { %886 = vsyncadd (%p1262_p3), %s225_s5, 4294967040  ;;  %p1263_p1 = scmp.ne.s32.totalorder %s1252_s23, 0 }
  0x6f   : > { %888 = dma.done.wait (%p1263_p1), [#allocation6], 256  }
  0x70   : > { %890 = vsyncadd (%p1263_p1), [#allocation6], 4294967040  ;;  %v926_v0 = vmov 0.0   ;;  %v927_v1 = vmov 0   ;;  %v277_v2 = vld [vmem:[%s228_s30 + $0x8] sm:$0xff]  ;;  %v276_v3 = vld [vmem:[%s228_s30] sm:$0xff] }
  0x71   : > { %352 = vmatprep.mubr.f32.mxu0 %v926_v0  ;;  %716 = vset.pattern.permute.xlu0 %v927_v1  ;;  %vm271_vm0 = vcmask 64512   ;;  %v275_v4 = vld [vmem:[#allocation5] sm:$0xff]  ;;  %v278_v5 = vld [vmem:[#allocation7] sm:$0xff]  ;;  %s616_s25 = sshll.u32 %s1133_s13, 3  ;;  %vm273_vm1 = vcmask 7168   ;;  %s621_s10 = sshll.u32 %s913_s18, 7 }
  0x72   : > { %288 = vmatprep.subr.mxu0 %v277_v2  ;;  %281 = vperm.xlu0 %716, %v278_v5   ;;  %s265_s27 = scalar_lea.vmem [#allocation9], %s616_s25  ;;  %s1148_s23 = scalar_lea.vmem [#allocation8], %s616_s25 }
  0x73   : > { %289 = vmatpush1.msra.mxu0 %v276_v3  ;;  %274 = vst.msk [vmem:[%s265_s27] sm:$0xff] %vm273_vm1, %v926_v0  ;;  %s471_s11 = sshll.u32 %s265_s27, 4  ;;  %s1158_s8 = scalar_lea.hbm %s1247_s4, %s621_s10  ;;  %s1160_s11 = int_to_ptr.vmem [resolvable:$true] %s471_s11 }
  0x74   : > { %618 = vmatmul.mubr.msk.f32.vlgmr.msra.gmra.mrb[0].mxu0 %vm271_vm0, %v275_v4  ;;  %272 = vst.msk [vmem:[%s1148_s23] sm:$0xff] %vm271_vm0, %v926_v0  ;;  %s445_s28 = scalar_lea.sflag [#allocation10], %s1133_s13  ;;  %s803_s9 = scalar_lea.vmem %s1160_s11, 128 }
  0x75   : > { %p804_p11 = scmp.ne.s32.totalorder %s1160_s11, %s803_s9  ;;  %s928_s24 = smov [#allocation9]  }
  0x76   : > { %s807_s21 = sshll.u32 %s928_s24, 4  ;;  %s808_s21 = int_to_ptr.vmem [resolvable:$false] %s807_s21 }
  0x77   : > { %p805_p4 = pnand %p804_p11, %p1081_p8  ;;  %s809_s22 = scalar_lea.vmem %s808_s21, 256 }
  0x78   : > { %p810_p6 = scmp.lt.s32.totalorder %s1160_s11, %s808_s21  ;;  %p811_p12 = scmp.lt.s32.totalorder %s809_s22, %s803_s9 }
  0x79   : > { %p806_p2 = pneg %p805_p4 }
  0x7a   : > { %v432_v12 = vld [vmem:[%s265_s27] sm:$0xff]  ;;  %p812_p0 = por %p811_p12, %p810_p6 }
  0x7c   : > { %p813_p5 = pnand %p812_p0, %p806_p2 }
  0xf1   : > { %v282_v6 = vpop.permute.xlu0 %281 }
 0x147   : > { %v354_v7 = vpop.f32.mrb[0].mxu0 }
 0x148   : > { %v355_v8 = vadd.f32 %v354_v7, %v282_v6  ;;  %v356_v9 = vpop.f32.mrb[1].mxu0 }
 0x149   : > { %v357_v10 = vadd.f32 %v356_v9, %v282_v6 }
 0x14b   : > { %360 = vmatprep.subr.mxu1 %v357_v10  ;;  %424 = vmatprep.mubr.f32.mxu1 %v357_v10  ;;  %v433_v11 = vadd.f32 %v357_v10, %v355_v8 }
 0x14c   : > { %361 = vmatpush1.xpose.msra.mxu1 %v355_v8 }
 0x14d   : > { %434 = vadd.xlane.f32.xlu0 %v433_v11 }
 0x14f   : > { %425 = vmatmul.mubr.f32.vlgmr.msra.gmra.mrb[0].mxu1 %v355_v8 }
 0x1da   : > { %v435_v13 = vpop.xlane.xlu0 %434 }
 0x1db   : > { %v436_v14 = vadd.f32 %v435_v13, %v432_v12 }
 0x1dd   : > { %438 = vst.msk [vmem:[%s265_s27] sm:$0xff] %vm273_vm1, %v436_v14 }
 0x1de   : > { %816 = shalt.err (!%p813_p5)
}
 0x1df   : > { %s817_s5 = scalar_lea.hbm %s1158_s8, 128  ;;  %s821_s27 = scalar_lea.hbm %s1247_s4, 256 }
 0x1e0   : > { %p818_p10 = scmp.ne.s32.totalorder %s1158_s8, %s817_s5  ;;  %p822_p7 = scmp.lt.u32.totalorder %s1158_s8, %s1247_s4 }
 0x1e1   : > { %p823_p3 = scmp.lt.u32.totalorder %s821_s27, %s817_s5  ;;  %p825_p11 = scmp.lt.u32.totalorder %s817_s5, %s1158_s8 }
 0x1e2   : > { %p819_p13 = pnand %p818_p10, %p1081_p8 }
 0x1e3   : > { %p824_p1 = por %p823_p3, %p822_p7 }
 0x1e4   : > { %p820_p9 = pneg %p819_p13 }
 0x1e5   : > { %p826_p4 = por %p825_p11, %p824_p1 }
 0x1e7   : > { %p827_p2 = pnand %p826_p4, %p820_p9 }
 0x1e9   : > { %830 = shalt.err (!%p827_p2)
}
 0x1ea   : > { %637 = dma.vmem_to_hbm [thread:$0]  (%p1081_p8), %s1160_s11, 128, %s1158_s8, %s445_s28   ;;  %v359_v15 = vld [vmem:[%s1148_s23] sm:$0xff] }
 0x1eb   : > { %s458_s9 = sshll.u32 %s1148_s23, 4  ;;  %s1192_s22 = scalar_lea.hbm %s1246_s3, %s621_s10  ;;  %s1194_s9 = int_to_ptr.vmem [resolvable:$true] %s458_s9 }
 0x1ec   : > { %s440_s5 = scalar_lea.sflag [#allocation4], %s1133_s13  ;;  %s831_s11 = scalar_lea.vmem %s1194_s9, 128 }
 0x1ed   : > { %p832_p6 = scmp.ne.s32.totalorder %s1194_s9, %s831_s11  ;;  %s929_s8 = smov [#allocation8]  }
 0x1ee   : > { %s835_s18 = sshll.u32 %s929_s8, 4  ;;  %s836_s18 = int_to_ptr.vmem [resolvable:$false] %s835_s18 }
 0x1ef   : > { %p833_p12 = pnand %p832_p6, %p1081_p8  ;;  %s837_s28 = scalar_lea.vmem %s836_s18, 256 }
 0x1f0   : > { %p838_p5 = scmp.lt.s32.totalorder %s1194_s9, %s836_s18  ;;  %p839_p10 = scmp.lt.s32.totalorder %s837_s28, %s831_s11 }
 0x1f1   : > { %p834_p0 = pneg %p833_p12 }
 0x1f2   : > { %p840_p13 = por %p839_p10, %p838_p5 }
 0x1f4   : > { %p841_p9 = pnand %p840_p13, %p834_p0 }
 0x222   : > { %v426_v16 = vpop.f32.mrb[0].mxu1 }
 0x223   : > { %v430_v17 = vadd.f32 %v426_v16, %v359_v15  ;;  %v428_v18 = vpop.f32.mrb[1].mxu1 }
 0x225   : > { %431 = vst.msk [vmem:[%s1148_s23] sm:$0xff] %vm271_vm0, %v430_v17 }
 0x226   : > { %844 = shalt.err (!%p841_p9)
}
 0x227   : > { %s845_s13 = scalar_lea.hbm %s1192_s22, 128  ;;  %s849_s30 = scalar_lea.hbm %s1246_s3, 256 }
 0x228   : > { %p846_p7 = scmp.ne.s32.totalorder %s1192_s22, %s845_s13  ;;  %p850_p11 = scmp.lt.u32.totalorder %s1192_s22, %s1246_s3 }
 0x229   : > { %p851_p4 = scmp.lt.u32.totalorder %s849_s30, %s845_s13  ;;  %p853_p6 = scmp.lt.u32.totalorder %s845_s13, %s1192_s22 }
 0x22a   : > { %p847_p3 = pnand %p846_p7, %p1081_p8 }
 0x22b   : > { %p852_p2 = por %p851_p4, %p850_p11 }
 0x22c   : > { %p848_p1 = pneg %p847_p3 }
 0x22d   : > { %p854_p12 = por %p853_p6, %p852_p2 }
 0x22f   : > { %p855_p0 = pnand %p854_p12, %p848_p1 }
 0x231   : > { %858 = shalt.err (!%p855_p0)
}
 0x232   : > { %636 = dma.vmem_to_hbm [thread:$0]  (%p1081_p8), %s1194_s9, 128, %s1192_s22, %s440_s5  }
 0x233 PF: > { %s483_s29 = sand.u32 1, %s901_s15   ;;  %p1264_p5 = scmp.ne.s32.totalorder %s1255_s26, 0 }
 0x234   : > { %p1265_p10 = scmp.ge.s32.totalorder %s921_s20, 2  ;;  %s484_s12 = scalar_lea.sflag [#allocation4], %s483_s29 }
 0x236   : > { %p652_p13 = pnand %p1265_p10, %p1264_p5 }
 0x238   : > { %892 = dma.done.wait (!%p652_p13), %s484_s12, 128  }
 0x239   : > { %894 = vsyncadd (!%p652_p13), %s484_s12, 4294967168  ;;  %s493_s24 = scalar_lea.sflag [#allocation10], %s483_s29 }
 0x23a   : > { %896 = dma.done.wait (!%p652_p13), %s493_s24, 128  }
 0x23b   : > { %898 = vsyncadd (!%p652_p13), %s493_s24, 4294967168  ;;  %s25_s20 = sadd.s32 1, %s921_s20   ;;  %s1266_s15 = smov %s905_s16 }
 0x23c   : > { %p22_p9 = scmp.ge.s32.totalorder %s25_s20, 4   ;;  %s1267_s16 = smov %s909_s17 }
 0x23d   : > { %s1268_s17 = smov %s1090_s7  ;;  %s1269_s18 = smov %s917_s19 }
 0x23e   : > { %s1270_s19 = smov %s1272_s14  ;;  %24 = sbr.rel (!%p22_p9) target bundleno = 9 (0x9), region = 106 }
 0x245   :  { %498 = vsyncpa [#allocation3], 1 }
 0x246   :  { %500 = vsyncpa [#allocation3 + $0x1], 1 }
 0x247   :  { %501 = vsyncpa [#allocation6], 1 }
 0x248   :  { %502 = vsyncpa [#allocation4], 1 }
 0x249   :  { %504 = vsyncpa [#allocation4 + $0x1], 1 }
 0x24a   :  { %505 = vsyncpa [#allocation10], 1 }
 0x24b   :  { %507 = vsyncpa [#allocation10 + $0x1], 1 }

</bundles_post_ra>
